<compile_context>
chip_gen: v5e
topology: v5e:2x2
jax: 0.10.0
libtpu: 0.0.40
codegen_flags: <defaults>
</compile_context>

<pallas_src>
import jax
import jax.numpy as jnp
from jax.experimental import pallas as pl
from jax.experimental.pallas import tpu as pltpu


# ---------------------------------------------------------------------------
# Kernels
# ---------------------------------------------------------------------------

def ffn_kernel_fused(x_ref, w1_ref, b1_ref, w2_ref, b2_ref, out_ref):
    """Whole d_ff resident in VMEM: single pass, no accumulator scratch."""
    # First Linear: bf16 x bf16 -> f32 accumulate on the MXU.
    h = jnp.dot(x_ref[...], w1_ref[...], preferred_element_type=jnp.float32)
    # Bias + ReLU in f32 on the VPU.
    h = jnp.maximum(h + b1_ref[...], 0.0)
    # Dropout == identity (eval / inference mode).
    y = jnp.dot(h.astype(w2_ref.dtype), w2_ref[...],
                preferred_element_type=jnp.float32)
    out_ref[...] = (y + b2_ref[...]).astype(out_ref.dtype)


def ffn_kernel_tiled(x_ref, w1_ref, b1_ref, w2_ref, b2_ref, out_ref, acc_ref):
    """d_ff streamed in tf-wide tiles; f32 accumulator finalized on last tile."""
    f = pl.program_id(1)

    @pl.when(f == 0)
    def _init():
        acc_ref[...] = jnp.zeros_like(acc_ref)

    h = jnp.dot(x_ref[...], w1_ref[...], preferred_element_type=jnp.float32)
    h = jnp.maximum(h + b1_ref[...], 0.0)
    # Dropout == identity (eval / inference mode).
    acc_ref[...] += jnp.dot(h.astype(w2_ref.dtype), w2_ref[...],
                            preferred_element_type=jnp.float32)

    @pl.when(f == pl.num_programs(1) - 1)
    def _finalize():
        out_ref[...] = (acc_ref[...] + b2_ref[...]).astype(out_ref.dtype)


# ---------------------------------------------------------------------------
# Host-side helpers
# ---------------------------------------------------------------------------

def _round_up(x, m):
    return ((x + m - 1) // m) * m


def _vmem_capacity_bytes():
    """Chip VMEM capacity; conservative v7x-sized fallback if unavailable."""
    try:
        return int(pltpu.get_tpu_info().vmem_capacity_bytes)
    except Exception:
        return 64 * 1024 * 1024


def _resident_bytes(tm, tf, D, nf):
    """Estimated VMEM-resident set for one grid step (double-buffered tiles)."""
    b = 2 * tm * D * 2            # x tile, bf16, double-buffered
    b += 2 * tm * D * 4           # out tile, f32, double-buffered
    b += 2 * D * tf * 2           # w1 tile, bf16
    b += 2 * tf * D * 2           # w2 tile, bf16
    b += 2 * tf * 4 + 2 * D * 4   # bias tiles, f32
    b += tm * tf * (4 + 2)        # h intermediate (f32) + its bf16 cast copy
    if nf > 1:
        b += tm * D * 4           # f32 accumulator scratch
    return b


def _select_tiles(M, D, d_ff, budget, tm_max=256):
    """Pick (tm, tf) fitting the VMEM budget; tm multiple of 16, tf of 128."""
    tm = max(16, min(tm_max, _round_up(M, 16)))
    # Prefer >= 2 token tiles (v7x megacore) when there is enough work.
    if tm >= 256 and _round_up(M, tm) // tm == 1:
        tm //= 2

    tf_cands = [d_ff] + [t for t in (512, 256, 128) if t < d_ff and d_ff % t == 0]

    cur_tm = tm
    while True:
        for tf in tf_cands:
            nf = d_ff // tf
            if _resident_bytes(cur_tm, tf, D, nf) <= budget:
                return cur_tm, tf
        if cur_tm <= 16:
            # Last resort: smallest legal tiles.
            return 16, tf_cands[-1]
        cur_tm = max(16, _round_up(cur_tm // 2, 16))


def prepare_ffn_params(w1, b1, w2, b2):
    """One-time weight prep (hoisted out of the forward path).

    Torch nn.Linear layout in:  w1 (d_ff, d_model), b1 (d_ff,),
                                w2 (d_model, d_ff), b2 (d_model,)
    Out: (in, out)-layout bf16 weights + f32 row-vector biases.
    """
    d_ff, D = w1.shape
    assert w2.shape == (D, d_ff)
    return {
        "w1": jnp.asarray(w1.T, jnp.bfloat16),            # (D, d_ff)
        "b1": jnp.asarray(b1, jnp.float32).reshape(1, d_ff),
        "w2": jnp.asarray(w2.T, jnp.bfloat16),            # (d_ff, D)
        "b2": jnp.asarray(b2, jnp.float32).reshape(1, D),
    }


def feed_forward_block(x, params, *, tm_max=256):
    """Applies the FFN to x of shape (..., d_model) using prepared params."""
    orig_shape = x.shape
    D = orig_shape[-1]
    d_ff = params["w1"].shape[1]
    assert params["w1"].shape == (D, d_ff) and params["w2"].shape == (d_ff, D)
    assert D % 128 == 0, "d_model must be lane-aligned (multiple of 128)"
    assert d_ff % 128 == 0, "d_ff must be lane-aligned (multiple of 128)"

    # Flatten tokens.
    x2 = x.reshape(-1, D)
    M = x2.shape[0]

    # VMEM budget: ~70% of chip capacity (≈45 MiB on v7x, ≈90 MiB on v5e/v6e).
    budget = int(0.7 * _vmem_capacity_bytes())
    tm, tf = _select_tiles(M, D, d_ff, budget, tm_max=tm_max)
    assert tm % 16 == 0, "tm must be a multiple of 16 (bf16 sublane packing)"
    assert tf == d_ff or tf % 128 == 0

    nm = pl.cdiv(M, tm)
    M_pad = nm * tm
    if M_pad != M:
        x2 = jnp.pad(x2, ((0, M_pad - M), (0, 0)))
    nf = d_ff // tf

    x_bf = x2.astype(jnp.bfloat16)
    w1_t, b1_2d = params["w1"], params["b1"]
    w2_t, b2_2d = params["w2"], params["b2"]

    resident = _resident_bytes(tm, tf, D, nf)
    vmem_limit = int(min(max(int(1.5 * resident), 8 * 1024 * 1024),
                         int(0.9 * _vmem_capacity_bytes())))

    # Advisory cost estimate for the XLA scheduler.
    weight_bytes = 2 * D * d_ff * 2                      # W1 + W2 in bf16
    weight_passes = 1 if nf == 1 else nm
    cost = pl.CostEstimate(
        flops=4 * M_pad * D * d_ff,
        bytes_accessed=(M_pad * D * 2                     # x read (bf16)
                        + M_pad * D * x.dtype.itemsize    # out write
                        + weight_passes * weight_bytes),
        transcendentals=0,
    )

    if nf == 1:
        # Weight-resident fast path: weights DMA'd once, no accumulator.
        out = pl.pallas_call(
            ffn_kernel_fused,
            out_shape=jax.ShapeDtypeStruct((M_pad, D), x.dtype),
            grid_spec=pltpu.PrefetchScalarGridSpec(
                num_scalar_prefetch=0,
                grid=(nm,),
                in_specs=[
                    pl.BlockSpec((tm, D), lambda i: (i, 0)),     # x tile
                    pl.BlockSpec((D, d_ff), lambda i: (0, 0)),   # W1 (resident)
                    pl.BlockSpec((1, d_ff), lambda i: (0, 0)),   # b1 (resident)
                    pl.BlockSpec((d_ff, D), lambda i: (0, 0)),   # W2 (resident)
                    pl.BlockSpec((1, D), lambda i: (0, 0)),      # b2 (resident)
                ],
                out_specs=pl.BlockSpec((tm, D), lambda i: (i, 0)),
            ),
            compiler_params=pltpu.CompilerParams(
                dimension_semantics=("parallel",),
                vmem_limit_bytes=vmem_limit,
            ),
            cost_estimate=cost,
        )(x_bf, w1_t, b1_2d, w2_t, b2_2d)
    else:
        # Tiled-reduction path over d_ff with f32 accumulator.
        out = pl.pallas_call(
            ffn_kernel_tiled,
            out_shape=jax.ShapeDtypeStruct((M_pad, D), x.dtype),
            grid_spec=pltpu.PrefetchScalarGridSpec(
                num_scalar_prefetch=0,
                grid=(nm, nf),
                in_specs=[
                    pl.BlockSpec((tm, D), lambda i, f: (i, 0)),  # x (resident over f)
                    pl.BlockSpec((D, tf), lambda i, f: (0, f)),  # W1 tile
                    pl.BlockSpec((1, tf), lambda i, f: (0, f)),  # b1 tile
                    pl.BlockSpec((tf, D), lambda i, f: (f, 0)),  # W2 tile
                    pl.BlockSpec((1, D), lambda i, f: (0, 0)),   # b2
                ],
                out_specs=pl.BlockSpec((tm, D), lambda i, f: (i, 0)),
                scratch_shapes=[pltpu.VMEM((tm, D), jnp.float32)],
            ),
            compiler_params=pltpu.CompilerParams(
                dimension_semantics=("parallel", "arbitrary"),
                vmem_limit_bytes=vmem_limit,
            ),
            cost_estimate=cost,
        )(x_bf, w1_t, b1_2d, w2_t, b2_2d)

    return out[:M].reshape(orig_shape)


# ---------------------------------------------------------------------------
# References
# ---------------------------------------------------------------------------

def reference_bf16(x, w1, b1, w2, b2):
    """Pure-JAX reference matching the kernel's bf16-operand / f32-accumulate math."""
    xb = x.astype(jnp.bfloat16)
    w1_t = jnp.transpose(w1).astype(jnp.bfloat16)
    w2_t = jnp.transpose(w2).astype(jnp.bfloat16)
    h = jnp.dot(xb, w1_t, preferred_element_type=jnp.float32) + b1
    h = jnp.maximum(h, 0.0)
    return jnp.dot(h.astype(jnp.bfloat16), w2_t,
                   preferred_element_type=jnp.float32) + b2


def reference_f32(x, w1, b1, w2, b2):
    """Full-precision reference mirroring the PyTorch forward (eval mode)."""
    h = jnp.maximum(x @ w1.T + b1, 0.0)
    return h @ w2.T + b2


if __name__ == "__main__":
    # Small but lane/sublane-aligned shapes (d_model, d_ff multiples of 128).
    B, S, D, D_FF = 2, 32, 128, 256

    key = jax.random.PRNGKey(0)
    kx, k1, k2, k3, k4 = jax.random.split(key, 5)
    scale = 0.1
    x = jax.random.normal(kx, (B, S, D), jnp.float32)
    # torch nn.Linear layout: weight (out_features, in_features), bias (out_features,)
    w1 = scale * jax.random.normal(k1, (D_FF, D), jnp.float32)
    b1 = scale * jax.random.normal(k2, (D_FF,), jnp.float32)
    w2 = scale * jax.random.normal(k3, (D, D_FF), jnp.float32)
    b2 = scale * jax.random.normal(k4, (D,), jnp.float32)

    # One-time weight prep (hoisted out of the forward / hot path).
    params = prepare_ffn_params(w1, b1, w2, b2)

    out = feed_forward_block(x, params)
    out = jax.block_until_ready(out)

    ref_bf = reference_bf16(x, w1, b1, w2, b2)
    ref_fp = reference_f32(x, w1, b1, w2, b2)

    assert out.shape == (B, S, D)
    # Tight check against the same bf16-operand / f32-accumulate math.
    assert jnp.allclose(out, ref_bf, atol=1e-4, rtol=1e-4), "mismatch vs bf16 reference"
    # Looser semantic check against the full-f32 PyTorch-equivalent forward.
    # TODO(synk): Dropout is identity here (eval mode); training-mode RNG dropout
    # would need pltpu.prng_seed/prng_random_bits inside the kernel.
    assert jnp.allclose(out, ref_fp, atol=5e-2, rtol=5e-2), "mismatch vs f32 reference"

    print("KERNEL_OK")
</pallas_src>

<mosaic_0001>
module attributes {stable_mosaic.version = 11 : i64} {
  func.func @ffn_kernel_fused(%arg0: i32, %arg1: memref<64x128xbf16, #tpu.memory_space<vmem>>, %arg2: memref<128x256xbf16, #tpu.memory_space<vmem>>, %arg3: memref<1x256xf32, #tpu.memory_space<vmem>>, %arg4: memref<256x128xbf16, #tpu.memory_space<vmem>>, %arg5: memref<1x128xf32, #tpu.memory_space<vmem>>, %arg6: memref<64x128xf32, #tpu.memory_space<vmem>>) attributes {dimension_semantics = [#tpu.dimension_semantics<parallel>], iteration_bounds = array<i64: 1>, scalar_prefetch = 0 : i64, scratch_operands = 0 : i64, tpu.core_type = #tpu.core_type<tc>, window_params = [{transform_indices = @transform_0, window_bounds = array<i64: 64, 128>}, {pipeline_mode = #tpu.pipeline_mode<synchronous>, transform_indices = @transform_1, window_bounds = array<i64: 128, 256>}, {pipeline_mode = #tpu.pipeline_mode<synchronous>, transform_indices = @transform_2, window_bounds = array<i64: 1, 256>}, {pipeline_mode = #tpu.pipeline_mode<synchronous>, transform_indices = @transform_3, window_bounds = array<i64: 256, 128>}, {pipeline_mode = #tpu.pipeline_mode<synchronous>, transform_indices = @transform_4, window_bounds = array<i64: 1, 128>}, {transform_indices = @transform_5, window_bounds = array<i64: 64, 128>}]} {
    %c0 = arith.constant 0 : index
    %c0_0 = arith.constant 0 : index
    %0 = vector.load %arg1[%c0, %c0_0] : memref<64x128xbf16, #tpu.memory_space<vmem>>, vector<64x128xbf16>
    %c0_1 = arith.constant 0 : index
    %c0_2 = arith.constant 0 : index
    %1 = vector.load %arg2[%c0_1, %c0_2] : memref<128x256xbf16, #tpu.memory_space<vmem>>, vector<128x256xbf16>
    %cst = arith.constant dense<0.000000e+00> : vector<64x256xf32>
    %2 = tpu.matmul %0, %1, %cst {dimension_numbers = #tpu.dot_dimension_numbers<[1], [0], [0], [1], [0, 0, 1, 1], [], []>} : vector<64x128xbf16>, vector<128x256xbf16>, vector<64x256xf32> -> vector<64x256xf32>
    %c0_3 = arith.constant 0 : index
    %c0_4 = arith.constant 0 : index
    %3 = vector.load %arg3[%c0_3, %c0_4] : memref<1x256xf32, #tpu.memory_space<vmem>>, vector<1x256xf32>
    %4 = vector.broadcast %3 : vector<1x256xf32> to vector<64x256xf32>
    %5 = arith.addf %2, %4 : vector<64x256xf32>
    %cst_5 = arith.constant 0.000000e+00 : f32
    %6 = vector.broadcast %cst_5 : f32 to vector<64x256xf32>
    %7 = arith.maximumf %5, %6 : vector<64x256xf32>
    %8 = arith.truncf %7 : vector<64x256xf32> to vector<64x256xbf16>
    %c0_6 = arith.constant 0 : index
    %c0_7 = arith.constant 0 : index
    %9 = vector.load %arg4[%c0_6, %c0_7] : memref<256x128xbf16, #tpu.memory_space<vmem>>, vector<256x128xbf16>
    %cst_8 = arith.constant dense<0.000000e+00> : vector<64x128xf32>
    %10 = tpu.matmul %8, %9, %cst_8 {dimension_numbers = #tpu.dot_dimension_numbers<[1], [0], [0], [1], [0, 0, 1, 1], [], []>} : vector<64x256xbf16>, vector<256x128xbf16>, vector<64x128xf32> -> vector<64x128xf32>
    %c0_9 = arith.constant 0 : index
    %c0_10 = arith.constant 0 : index
    %11 = vector.load %arg5[%c0_9, %c0_10] : memref<1x128xf32, #tpu.memory_space<vmem>>, vector<1x128xf32>
    %12 = vector.broadcast %11 : vector<1x128xf32> to vector<64x128xf32>
    %13 = arith.addf %10, %12 : vector<64x128xf32>
    %c0_11 = arith.constant 0 : index
    %c0_12 = arith.constant 0 : index
    %14 = vector.load %arg6[%c0_11, %c0_12] : memref<64x128xf32, #tpu.memory_space<vmem>>, vector<64x128xf32>
    tpu.vector_store %arg6[%c0_11, %c0_12], %13 {strides = array<i32>} : memref<64x128xf32, #tpu.memory_space<vmem>>, vector<64x128xf32>,
    return
  }
  func.func @transform_0(%arg0: i32) -> (i32, i32) {
    %c0_i32 = arith.constant 0 : i32
    %c0_i32_0 = arith.constant 0 : i32
    return %arg0, %c0_i32 : i32, i32
  }
  func.func @transform_1(%arg0: i32) -> (i32, i32) {
    %c0_i32 = arith.constant 0 : i32
    %c0_i32_0 = arith.constant 0 : i32
    %c0_i32_1 = arith.constant 0 : i32
    return %c0_i32, %c0_i32_0 : i32, i32
  }
  func.func @transform_2(%arg0: i32) -> (i32, i32) {
    %c0_i32 = arith.constant 0 : i32
    %c0_i32_0 = arith.constant 0 : i32
    %c0_i32_1 = arith.constant 0 : i32
    return %c0_i32, %c0_i32_0 : i32, i32
  }
  func.func @transform_3(%arg0: i32) -> (i32, i32) {
    %c0_i32 = arith.constant 0 : i32
    %c0_i32_0 = arith.constant 0 : i32
    %c0_i32_1 = arith.constant 0 : i32
    return %c0_i32, %c0_i32_0 : i32, i32
  }
  func.func @transform_4(%arg0: i32) -> (i32, i32) {
    %c0_i32 = arith.constant 0 : i32
    %c0_i32_0 = arith.constant 0 : i32
    %c0_i32_1 = arith.constant 0 : i32
    return %c0_i32, %c0_i32_0 : i32, i32
  }
  func.func @transform_5(%arg0: i32) -> (i32, i32) {
    %c0_i32 = arith.constant 0 : i32
    %c0_i32_0 = arith.constant 0 : i32
    return %arg0, %c0_i32 : i32, i32
  }
}

</mosaic_0001>

<bundles_post_ra>
// kernel: tpu_custom_call.1
= control target key start
LH: loop header
LB: loop body
LE: loop exit
PB: predicated region body
PF: predicated region fallthrough
CT: control target
= control target key end

     0   :  { %10 = vsyncpa [#allocation3], 0  ;;  %s898_s0 = inlined_call_operand.hbm [shape: bf16[64,128], index: 0, kind: input, shape index: {}]   ;;  %s899_s1 = inlined_call_operand.hbm [shape: bf16[128,256], index: 1, kind: input, shape index: {}]   ;;  %s900_s2 = inlined_call_operand.hbm [shape: f32[1,256], index: 2, kind: input, shape index: {}]   ;;  %s901_s3 = inlined_call_operand.hbm [shape: bf16[256,128], index: 3, kind: input, shape index: {}]   ;;  %s902_s4 = inlined_call_operand.vmem [shape: f32[1,128], index: 4, kind: input, shape index: {}]   ;;  %s903_s5 = inlined_call_operand.hbm [shape: f32[64,128], index: 5, kind: output, shape index: {}]  }
   0x1   :  { %11 = vsyncpa [#allocation6], 0 }
   0x2   :  { %12 = vsyncpa [#allocation9], 0  ;;  %s31_s20 = sshll.u32 %s899_s1, 4  ;;  %s32_s20 = int_to_ptr.hbm [resolvable:$true] %s31_s20 }
   0x3   :  { %13 = vsyncpa [#allocation4], 0  ;;  %s835_s21 = smov [#allocation5]   ;;  %s18_s25 = sshll.u32 %s898_s0, 4  ;;  %s19_s25 = int_to_ptr.hbm [resolvable:$true] %s18_s25 }
   0x4   :  { %s33_s22 = sshll.u32 %s835_s21, 4  ;;  %s836_s26 = smov 128   ;;  %s34_s22 = int_to_ptr.vmem [resolvable:$true] %s33_s22 }
   0x5   :  { %s837_s27 = smov 8   ;;  %s838_s28 = smov [#allocation2]  }
   0x6   :  { %39 = dma.hbm_to_vmem [thread:$0]  %s32_s20, 2048, %s34_s22, [#allocation6], %s836_s26, %s836_s26, %s837_s27  }
   0x7   :  { %s20_s29 = sshll.u32 %s838_s28, 4  ;;  %s839_s1 = smov 64   ;;  %s21_s29 = int_to_ptr.vmem [resolvable:$true] %s20_s29 }
   0x8   :  { %s840_s30 = smov 4   ;;  %s45_s8 = sshll.u32 %s900_s2, 4  ;;  %s46_s8 = int_to_ptr.hbm [resolvable:$true] %s45_s8 }
   0x9   :  { %26 = dma.hbm_to_vmem [thread:$0]  %s19_s25, 512, %s21_s29, [#allocation3], %s839_s1, %s839_s1, %s840_s30  }
   0xa   :  { %s841_s9 = smov [#allocation7]   ;;  %s55_s12 = sshll.u32 %s901_s3, 4  ;;  %s56_s12 = int_to_ptr.hbm [resolvable:$true] %s55_s12 }
   0xb   :  { %s47_s0 = sshll.u32 %s841_s9, 4  ;;  %s842_s13 = smov [#allocation8]   ;;  %s48_s0 = int_to_ptr.vmem [resolvable:$true] %s47_s0 }
   0xc   :  { %50 = dma.hbm_to_vmem [thread:$0]  %s46_s8, 32, %s48_s0, [#allocation6]  }
   0xd   :  { %s57_s14 = sshll.u32 %s842_s13, 4  ;;  %s58_s14 = int_to_ptr.vmem [resolvable:$true] %s57_s14 }
   0xe   :  { %63 = dma.hbm_to_vmem [thread:$0]  %s56_s12, 2048, %s58_s14, [#allocation9], %s839_s1, %s839_s1, %s840_s30  }
   0xf   :  { %827 = dma.done.wait [#allocation3], 512  }
  0x10   :  { %828 = vsyncadd [#allocation3], 4294966784 }
  0x11   :  { %829 = dma.done.wait [#allocation6], 2080  }
  0x12   :  { %830 = vsyncadd [#allocation6], 4294965216 }
  0x13   :  { %831 = dma.done.wait [#allocation9], 2048  }
  0x14   :  { %832 = vsyncadd [#allocation9], 4294965248  ;;  %v591_v0 = vld [vmem:[#allocation5 + $0x70] sm:$0xf]  ;;  %v680_v1 = vld [vmem:[#allocation5 + $0x74] sm:$0xf0] }
  0x15   :  { %v679_v2 = vld [vmem:[#allocation5 + $0x74] sm:$0xf]  ;;  %v592_v3 = vor.u32 %v680_v1, %v591_v0  ;;  %v593_v4 = vld [vmem:[#allocation5 + $0x78] sm:$0xf0]  ;;  %v583_v5 = vld [vmem:[#allocation5 + $0x60] sm:$0xf] }
  0x16   :  { %v678_v6 = vld [vmem:[#allocation5 + $0x64] sm:$0xf0]  ;;  %v596_v7 = vor.u32 %v679_v2, %v593_v4  ;;  %v677_v8 = vld [vmem:[#allocation5 + $0x64] sm:$0xf]  ;;  %v585_v9 = vld [vmem:[#allocation5 + $0x68] sm:$0xf0] }
  0x17   :  { %216 = vmatpush.bf16.msra.mxu0 %v592_v3  ;;  %v584_v10 = vor.u32 %v678_v6, %v583_v5  ;;  %v588_v11 = vor.u32 %v677_v8, %v585_v9  ;;  %v575_v12 = vld [vmem:[#allocation5 + $0x50] sm:$0xf]  ;;  %v676_v13 = vld [vmem:[#allocation5 + $0x54] sm:$0xf0]  ;;  %v675_v14 = vld [vmem:[#allocation5 + $0x54] sm:$0xf] }
  0x18   :  { %245 = vmatpush.bf16.msra.mxu1 %v596_v7  ;;  %v577_v15 = vld [vmem:[#allocation5 + $0x58] sm:$0xf0]  ;;  %v576_v16 = vor.u32 %v676_v13, %v575_v12  ;;  %v567_v18 = vld [vmem:[#allocation5 + $0x40] sm:$0xf]  ;;  %v674_v19 = vld [vmem:[#allocation5 + $0x44] sm:$0xf0] }
  0x19   :  { %v580_v17 = vor.u32 %v675_v14, %v577_v15  ;;  %v673_v20 = vld [vmem:[#allocation5 + $0x44] sm:$0xf]  ;;  %v569_v21 = vld [vmem:[#allocation5 + $0x48] sm:$0xf0]  ;;  %v568_v22 = vor.u32 %v674_v19, %v567_v18  ;;  %v559_v24 = vld [vmem:[#allocation5 + $0x30] sm:$0xf] }
  0x1a   :  { %v572_v23 = vor.u32 %v673_v20, %v569_v21  ;;  %v672_v25 = vld [vmem:[#allocation5 + $0x34] sm:$0xf0]  ;;  %v671_v26 = vld [vmem:[#allocation5 + $0x34] sm:$0xf]  ;;  %v561_v27 = vld [vmem:[#allocation5 + $0x38] sm:$0xf0] }
  0x1b   :  { %217 = vmatpush.bf16.msra.mxu0 %v584_v10  ;;  %v560_v28 = vor.u32 %v672_v25, %v559_v24  ;;  %v564_v29 = vor.u32 %v671_v26, %v561_v27  ;;  %v551_v30 = vld [vmem:[#allocation5 + $0x20] sm:$0xf]  ;;  %v670_v31 = vld [vmem:[#allocation5 + $0x24] sm:$0xf0]  ;;  %v669_v32 = vld [vmem:[#allocation5 + $0x24] sm:$0xf] }
  0x1c   :  { %246 = vmatpush.bf16.msra.mxu1 %v588_v11  ;;  %v553_v33 = vld [vmem:[#allocation5 + $0x28] sm:$0xf0]  ;;  %v552_v34 = vor.u32 %v670_v31, %v551_v30  ;;  %v543_v36 = vld [vmem:[#allocation5 + $0x10] sm:$0xf]  ;;  %v668_v37 = vld [vmem:[#allocation5 + $0x14] sm:$0xf0] }
  0x1d   :  { %v556_v35 = vor.u32 %v669_v32, %v553_v33  ;;  %v667_v38 = vld [vmem:[#allocation5 + $0x14] sm:$0xf]  ;;  %v545_v39 = vld [vmem:[#allocation5 + $0x18] sm:$0xf0]  ;;  %v544_v40 = vor.u32 %v668_v37, %v543_v36  ;;  %v535_v42 = vld [vmem:[#allocation5] sm:$0xf] }
  0x1e   :  { %v548_v41 = vor.u32 %v667_v38, %v545_v39  ;;  %v666_v43 = vld [vmem:[#allocation5 + $0x4] sm:$0xf0]  ;;  %v665_v44 = vld [vmem:[#allocation5 + $0x4] sm:$0xf]  ;;  %v537_v45 = vld [vmem:[#allocation5 + $0x8] sm:$0xf0] }
  0x1f   :  { %218 = vmatpush.bf16.msra.mxu0 %v576_v16  ;;  %v536_v46 = vor.u32 %v666_v43, %v535_v42  ;;  %v540_v47 = vor.u32 %v665_v44, %v537_v45  ;;  %v661_v48 = vld [vmem:[#allocation2] sm:$0xff]  ;;  %v662_v49 = vld [vmem:[#allocation2 + $0x8] sm:$0xff]  ;;  %v687_v52 = vld [vmem:[#allocation8 + $0x30] sm:$0xff]  ;;  %s502_s18 = sshll.u32 %s903_s5, 4  ;;  %s503_s18 = int_to_ptr.hbm [resolvable:$true] %s502_s18 }
  0x20   :  { %247 = vmatpush.bf16.msra.mxu1 %v580_v17  ;;  %v688_v50 = vld [vmem:[#allocation8 + $0x38] sm:$0xff]  ;;  %v695_v53 = vld [vmem:[#allocation8 + $0x70] sm:$0xff]  ;;  %v686_v54 = vld [vmem:[#allocation8 + $0x28] sm:$0xff] }
  0x21   :  { %v696_v51 = vld [vmem:[#allocation8 + $0x78] sm:$0xff]  ;;  %430 = vmatpush.bf16.msra.mxu2 %v688_v50  ;;  %v694_v55 = vld [vmem:[#allocation8 + $0x68] sm:$0xff]  ;;  %v685_v56 = vld [vmem:[#allocation8 + $0x20] sm:$0xff] }
  0x22   :  { %459 = vmatpush.bf16.msra.mxu3 %v696_v51  ;;  %v693_v57 = vld [vmem:[#allocation8 + $0x60] sm:$0xff]  ;;  %v663_v58 = vld [vmem:[#allocation2 + $0x10] sm:$0xff]  ;;  %v664_v59 = vld [vmem:[#allocation2 + $0x18] sm:$0xff] }
  0x23   :  { %219 = vmatpush.bf16.msra.mxu0 %v568_v22  ;;  %v684_v60 = vld [vmem:[#allocation8 + $0x18] sm:$0xff]  ;;  %v683_v62 = vld [vmem:[#allocation8 + $0x10] sm:$0xff]  ;;  %v682_v0 = vld [vmem:[#allocation8 + $0x8] sm:$0xff] }
  0x24   :  { %248 = vmatpush.bf16.msra.mxu1 %v572_v23  ;;  %v692_v61 = vld [vmem:[#allocation8 + $0x58] sm:$0xff]  ;;  %v691_v63 = vld [vmem:[#allocation8 + $0x50] sm:$0xff]  ;;  %v690_v1 = vld [vmem:[#allocation8 + $0x48] sm:$0xff] }
  0x25   :  { %431 = vmatpush.bf16.msra.mxu2 %v687_v52  ;;  %v681_v2 = vld [vmem:[#allocation8] sm:$0xff]  ;;  %v106_v4 = vld [vmem:[#allocation7] sm:$0x3] }
  0x26   :  { %460 = vmatpush.bf16.msra.mxu3 %v695_v53  ;;  %v689_v3 = vld [vmem:[#allocation8 + $0x40] sm:$0xff]  ;;  %v108_v7 = vperm.slane %v106_v4, 0  ;;  %v109_v8 = vperm.slane %v106_v4, 1 }
  0x27   :  { %220 = vmatpush.bf16.msra.mxu0 %v560_v28 }
  0x28   :  { %249 = vmatpush.bf16.msra.mxu1 %v564_v29 }
  0x29   :  { %432 = vmatpush.bf16.msra.mxu2 %v686_v54 }
  0x2a   :  { %461 = vmatpush.bf16.msra.mxu3 %v694_v55 }
  0x2b   :  { %221 = vmatpush.bf16.msra.mxu0 %v552_v34 }
  0x2c   :  { %250 = vmatpush.bf16.msra.mxu1 %v556_v35 }
  0x2d   :  { %433 = vmatpush.bf16.msra.mxu2 %v685_v56 }
  0x2e   :  { %462 = vmatpush.bf16.msra.mxu3 %v693_v57 }
  0x2f   :  { %222 = vmatpush.bf16.msra.mxu0 %v544_v40 }
  0x30   :  { %251 = vmatpush.bf16.msra.mxu1 %v548_v41 }
  0x31   :  { %434 = vmatpush.bf16.msra.mxu2 %v684_v60 }
  0x32   :  { %463 = vmatpush.bf16.msra.mxu3 %v692_v61 }
  0x33   :  { %223 = vmatpush.bf16.msra.mxu0 %v536_v46 }
  0x34   :  { %252 = vmatpush.bf16.msra.mxu1 %v540_v47 }
  0x35   :  { %435 = vmatpush.bf16.msra.mxu2 %v683_v62 }
  0x36   :  { %224 = vmatmul.bf16.vlgmr.msra.gmra.mxu0 %v661_v48  ;;  %464 = vmatpush.bf16.msra.mxu3 %v691_v63  ;;  %v706_v63 = vld [vmem:[%s902_s4] ss:$0 sm:$0xff]  ;;  %s843_s4 = smov [#allocation10]  }
  0x37   :  { %253 = vmatmul.bf16.vlgmr.msra.gmra.mxu1 %v661_v48  ;;  %s500_s15 = sshll.u32 %s843_s4, 4  ;;  %s501_s15 = int_to_ptr.vmem [resolvable:$true] %s500_s15 }
  0x39   :  { %436 = vmatpush.bf16.msra.mxu2 %v682_v0 }
  0x3a   :  { %465 = vmatpush.bf16.msra.mxu3 %v690_v1 }
  0x3d   :  { %437 = vmatpush.bf16.msra.mxu2 %v681_v2 }
  0x3e   :  { %466 = vmatpush.bf16.msra.mxu3 %v689_v3 }
  0x46   :  { %229 = vmatmul.bf16.gmra.mxu0 %v662_v49 }
  0x47   :  { %258 = vmatmul.bf16.gmra.mxu1 %v662_v49 }
  0x56   :  { %234 = vmatmul.bf16.gmra.mxu0 %v663_v58 }
  0x57   :  { %263 = vmatmul.bf16.gmra.mxu1 %v663_v58 }
  0x66   :  { %239 = vmatmul.bf16.gmra.mxu0 %v664_v59 }
  0x67   :  { %268 = vmatmul.bf16.gmra.mxu1 %v664_v59 }
  0xb3   :  { %v225_v5 = vpop.f32.mrf.mxu0 }
  0xb4   :  { %v254_v6 = vpop.f32.mrf.mxu1  ;;  %v226_v9 = vadd.f32 %v225_v5, %v108_v7 }
  0xb5   :  { %v255_v10 = vadd.f32 %v254_v6, %v109_v8 }
  0xb6   :  { %v274_v15 = vmax.f32 %v226_v9, 0.0 }
  0xb7   :  { %v275_v17 = vmax.f32 %v255_v10, 0.0 }
  0xbb   :  { %v227_v11 = vpop.f32.mrf.mxu0 }
  0xbc   :  { %v228_v12 = vadd.f32 %v227_v11, %v108_v7  ;;  %v256_v13 = vpop.f32.mrf.mxu1 }
  0xbd   :  { %v257_v14 = vadd.f32 %v256_v13, %v109_v8 }
  0xbe   :  { %v276_v16 = vmax.f32 %v228_v12, 0.0 }
  0xbf   :  { %v277_v18 = vmax.f32 %v257_v14, 0.0 }
  0xc0   :  { %v290_v19 = vpack.c.bf16 %v276_v16, %v274_v15 }
  0xc1   :  { %v291_v20 = vpack.c.bf16 %v277_v18, %v275_v17 }
  0xc2   :  { %438 = vmatmul.bf16.vlgmr.msra.gmra.mxu2 %v290_v19 }
  0xc3   :  { %467 = vmatmul.bf16.vlgmr.msra.gmra.mxu3 %v291_v20  ;;  %v230_v21 = vpop.f32.mrf.mxu0 }
  0xc4   :  { %v259_v22 = vpop.f32.mrf.mxu1  ;;  %v231_v23 = vadd.f32 %v230_v21, %v108_v7 }
  0xc5   :  { %v260_v24 = vadd.f32 %v259_v22, %v109_v8 }
  0xc6   :  { %v278_v29 = vmax.f32 %v231_v23, 0.0 }
  0xc7   :  { %v279_v31 = vmax.f32 %v260_v24, 0.0 }
  0xcb   :  { %v232_v25 = vpop.f32.mrf.mxu0 }
  0xcc   :  { %v233_v26 = vadd.f32 %v232_v25, %v108_v7  ;;  %v261_v27 = vpop.f32.mrf.mxu1 }
  0xcd   :  { %v262_v28 = vadd.f32 %v261_v27, %v109_v8 }
  0xce   :  { %v280_v30 = vmax.f32 %v233_v26, 0.0 }
  0xcf   :  { %v281_v32 = vmax.f32 %v262_v28, 0.0 }
  0xd0   :  { %v292_v33 = vpack.c.bf16 %v280_v30, %v278_v29 }
  0xd1   :  { %v293_v34 = vpack.c.bf16 %v281_v32, %v279_v31 }
  0xd2   :  { %443 = vmatmul.bf16.gmra.mxu2 %v292_v33 }
  0xd3   :  { %472 = vmatmul.bf16.gmra.mxu3 %v293_v34  ;;  %v235_v35 = vpop.f32.mrf.mxu0 }
  0xd4   :  { %v264_v36 = vpop.f32.mrf.mxu1  ;;  %v236_v37 = vadd.f32 %v235_v35, %v108_v7 }
  0xd5   :  { %v265_v38 = vadd.f32 %v264_v36, %v109_v8 }
  0xd6   :  { %v282_v43 = vmax.f32 %v236_v37, 0.0 }
  0xd7   :  { %v283_v45 = vmax.f32 %v265_v38, 0.0 }
  0xdb   :  { %v237_v39 = vpop.f32.mrf.mxu0 }
  0xdc   :  { %v238_v40 = vadd.f32 %v237_v39, %v108_v7  ;;  %v266_v41 = vpop.f32.mrf.mxu1 }
  0xdd   :  { %v267_v42 = vadd.f32 %v266_v41, %v109_v8 }
  0xde   :  { %v284_v44 = vmax.f32 %v238_v40, 0.0 }
  0xdf   :  { %v285_v46 = vmax.f32 %v267_v42, 0.0 }
  0xe0   :  { %v294_v47 = vpack.c.bf16 %v284_v44, %v282_v43 }
  0xe1   :  { %v295_v48 = vpack.c.bf16 %v285_v46, %v283_v45 }
  0xe2   :  { %448 = vmatmul.bf16.gmra.mxu2 %v294_v47 }
  0xe3   :  { %477 = vmatmul.bf16.gmra.mxu3 %v295_v48  ;;  %v240_v49 = vpop.f32.mrf.mxu0 }
  0xe4   :  { %v269_v50 = vpop.f32.mrf.mxu1  ;;  %v241_v51 = vadd.f32 %v240_v49, %v108_v7 }
  0xe5   :  { %v270_v52 = vadd.f32 %v269_v50, %v109_v8 }
  0xe6   :  { %v286_v57 = vmax.f32 %v241_v51, 0.0 }
  0xe7   :  { %v287_v59 = vmax.f32 %v270_v52, 0.0 }
  0xeb   :  { %v242_v53 = vpop.f32.mrf.mxu0 }
  0xec   :  { %v243_v54 = vadd.f32 %v242_v53, %v108_v7  ;;  %v271_v55 = vpop.f32.mrf.mxu1 }
  0xed   :  { %v272_v56 = vadd.f32 %v271_v55, %v109_v8 }
  0xee   :  { %v288_v58 = vmax.f32 %v243_v54, 0.0 }
  0xef   :  { %v289_v60 = vmax.f32 %v272_v56, 0.0 }
  0xf0   :  { %v296_v61 = vpack.c.bf16 %v288_v58, %v286_v57 }
  0xf1   :  { %v297_v62 = vpack.c.bf16 %v289_v60, %v287_v59 }
  0xf2   :  { %453 = vmatmul.bf16.gmra.mxu2 %v296_v61 }
  0xf3   :  { %482 = vmatmul.bf16.gmra.mxu3 %v297_v62 }
 0x145   :  { %v439_v0 = vpop.f32.mrf.mxu2 }
 0x146   :  { %v440_v1 = vadd.f32 %v706_v63, %v439_v0  ;;  %v468_v2 = vpop.f32.mrf.mxu3 }
 0x148   :  { %v469_v3 = vadd.f32 %v468_v2, %v440_v1 }
 0x14a   :  { %488 = vst [vmem:[#allocation10] sm:$0xff] %v469_v3 }
 0x14d   :  { %v441_v4 = vpop.f32.mrf.mxu2 }
 0x14e   :  { %v442_v5 = vadd.f32 %v706_v63, %v441_v4  ;;  %v470_v6 = vpop.f32.mrf.mxu3 }
 0x150   :  { %v471_v7 = vadd.f32 %v470_v6, %v442_v5 }
 0x152   :  { %489 = vst [vmem:[#allocation10 + $0x8] sm:$0xff] %v471_v7 }
 0x155   :  { %v444_v8 = vpop.f32.mrf.mxu2 }
 0x156   :  { %v445_v9 = vadd.f32 %v706_v63, %v444_v8  ;;  %v473_v10 = vpop.f32.mrf.mxu3 }
 0x158   :  { %v474_v11 = vadd.f32 %v473_v10, %v445_v9 }
 0x15a   :  { %490 = vst [vmem:[#allocation10 + $0x10] sm:$0xff] %v474_v11 }
 0x15d   :  { %v446_v12 = vpop.f32.mrf.mxu2 }
 0x15e   :  { %v447_v13 = vadd.f32 %v706_v63, %v446_v12  ;;  %v475_v14 = vpop.f32.mrf.mxu3 }
 0x160   :  { %v476_v15 = vadd.f32 %v475_v14, %v447_v13 }
 0x162   :  { %491 = vst [vmem:[#allocation10 + $0x18] sm:$0xff] %v476_v15 }
 0x165   :  { %v449_v16 = vpop.f32.mrf.mxu2 }
 0x166   :  { %v450_v17 = vadd.f32 %v706_v63, %v449_v16  ;;  %v478_v18 = vpop.f32.mrf.mxu3 }
 0x168   :  { %v479_v19 = vadd.f32 %v478_v18, %v450_v17 }
 0x16a   :  { %492 = vst [vmem:[#allocation10 + $0x20] sm:$0xff] %v479_v19 }
 0x16d   :  { %v451_v20 = vpop.f32.mrf.mxu2 }
 0x16e   :  { %v452_v21 = vadd.f32 %v706_v63, %v451_v20  ;;  %v480_v22 = vpop.f32.mrf.mxu3 }
 0x170   :  { %v481_v23 = vadd.f32 %v480_v22, %v452_v21 }
 0x172   :  { %493 = vst [vmem:[#allocation10 + $0x28] sm:$0xff] %v481_v23 }
 0x175   :  { %v454_v24 = vpop.f32.mrf.mxu2 }
 0x176   :  { %v455_v25 = vadd.f32 %v706_v63, %v454_v24  ;;  %v483_v26 = vpop.f32.mrf.mxu3 }
 0x178   :  { %v484_v27 = vadd.f32 %v483_v26, %v455_v25 }
 0x17a   :  { %494 = vst [vmem:[#allocation10 + $0x30] sm:$0xff] %v484_v27 }
 0x17d   :  { %v456_v28 = vpop.f32.mrf.mxu2 }
 0x17e   :  { %v457_v29 = vadd.f32 %v706_v63, %v456_v28  ;;  %v485_v30 = vpop.f32.mrf.mxu3 }
 0x180   :  { %v486_v31 = vadd.f32 %v485_v30, %v457_v29 }
 0x182   :  { %495 = vst [vmem:[#allocation10 + $0x38] sm:$0xff] %v486_v31 }
 0x183   :  { %508 = dma.vmem_to_hbm [thread:$0]  %s501_s15, 1024, %s503_s18, [#allocation4], %s836_s26, %s836_s26, %s837_s27  }
 0x184   :  { %833 = dma.done.wait [#allocation4], 1024  }
 0x185   :  { %834 = vsyncadd [#allocation4], 4294966272 }
 0x186   :  { %513 = vsyncpa [#allocation3], 1 }
 0x187   :  { %514 = vsyncpa [#allocation6], 1 }
 0x188   :  { %515 = vsyncpa [#allocation9], 1 }
 0x189   :  { %516 = vsyncpa [#allocation4], 1 }

</bundles_post_ra>
